<compile_context>
chip_gen: v6e
topology: v6e:2x2x1
jax: 0.10.0
libtpu: 0.0.40
codegen_flags: <defaults>
</compile_context>

<pallas_src>
import functools

import jax
import jax.numpy as jnp
from jax.experimental import pallas as pl
from jax.experimental.pallas import tpu as pltpu


# ----------------------------------------------------------------------------
# Fused kernel: bidirectional "LSTMCell_AddC" encoder -> "LSTMCell_AddC_decoder"
#               -> (out-proj ∘ hidden2tag) + log_softmax
# ----------------------------------------------------------------------------
def tagger_kernel(x_ref, h0e_ref, c0e_ref, wenc_ref,
                  h0d_ref, c0d_ref, ctx_ref, wdec_ref, w3_ref, w4_ref,
                  wtag_ref, btag_ref,
                  o_ref,
                  hf, cf, hb, cb, ef, eb, hd, cd,
                  *, num_tags):
    T, Bp, _ = x_ref.shape
    H = hf.shape[-1]
    Kp = o_ref.shape[-1]

    # TODO(synk): 'LSTMCell_AddC' lives in a private fork of torch.nn._functions.rnn;
    #             exact gate formula unavailable, assumed gates = x@Wih + h@Whh + c@Wch.
    def gate_block(gates, base, c_prev):
        i = jax.nn.sigmoid(gates[:, base + 0 * H:base + 1 * H])
        f = jax.nn.sigmoid(gates[:, base + 1 * H:base + 2 * H])
        g = jnp.tanh(gates[:, base + 2 * H:base + 3 * H])
        o = jax.nn.sigmoid(gates[:, base + 3 * H:base + 4 * H])
        c_new = f * c_prev + i * g
        h_new = o * jnp.tanh(c_new)
        return h_new, c_new

    # ------------------------- bidirectional encoder -------------------------
    hf[...] = h0e_ref[0]
    cf[...] = c0e_ref[0]
    hb[...] = h0e_ref[1]
    cb[...] = c0e_ref[1]

    @pl.loop(0, T)
    def _(t):
        tb = T - 1 - t
        # One fused MXU contraction per step: both directions, all 3 gate matrices.
        # NOTE: the (2*(E+2H), 8H) block-diagonal weight (~48 f32 vregs) is read from
        # VMEM inside the loop on purpose — it does not fit the 64-vreg file next to
        # the activations, so hoisting it into a value would only force a spill.
        lhs = jnp.concatenate(
            [x_ref[t], hf[...], cf[...], x_ref[tb], hb[...], cb[...]], axis=-1)
        gates = jnp.dot(lhs, wenc_ref[...], preferred_element_type=jnp.float32)

        h_f, c_f = gate_block(gates, 0, cf[...])          # forward direction
        hf[...] = h_f
        cf[...] = c_f
        ef[t] = h_f

        h_b, c_b = gate_block(gates, 4 * H, cb[...])      # backward direction
        hb[...] = h_b
        cb[...] = c_b
        eb[tb] = h_b

    # TODO(synk): bidirectional combine rule of the custom cell is unknown; the two
    # directions are summed so the encoder output stays HIDDEN_DIM wide (the decoder
    # of the original module consumes HIDDEN_DIM features).
    ef[...] = ef[...] + eb[...]

    # ---------- decoder + fused (out-proj ∘ hidden2tag) + log_softmax ----------
    hd[...] = h0d_ref[...]
    cd[...] = c0d_ref[...]

    # Loop-invariant hoists.
    w_dec = wdec_ref[...]                                              # (3H, 4H) fused [W0;W1;W2]
    ctx_bias = jnp.dot(ctx_ref[...], w3_ref[...],
                       preferred_element_type=jnp.float32)             # (Bp, 4H), constant in t
    w_out = jnp.dot(w4_ref[...], wtag_ref[...],
                    preferred_element_type=jnp.float32)                # (H, Kp) = W4 @ W_tag(padded)
    bias = jnp.broadcast_to(btag_ref[...], (Bp, Kp))
    lane = jax.lax.broadcasted_iota(jnp.int32, (Bp, Kp), 1)
    valid = lane < num_tags

    @pl.loop(0, T)
    def _(t):
        # TODO(synk): exact 'LSTMCell_AddC_decoder' semantics unavailable; the 5 weight
        # matrices are used as input/hidden/cell/(fixed) context gate projections plus
        # a final (H,H) output projection (here folded into the tag head).
        lhs = jnp.concatenate([ef[t], hd[...], cd[...]], axis=-1)      # (Bp, 3H)
        gates = jnp.dot(lhs, w_dec, preferred_element_type=jnp.float32) + ctx_bias
        h_new, c_new = gate_block(gates, 0, cd[...])
        hd[...] = h_new
        cd[...] = c_new

        # folded out-projection + tag linear, then log_softmax over the tag axis.
        logits = jnp.dot(h_new, w_out, preferred_element_type=jnp.float32) + bias
        logits = jnp.where(valid, logits, -1e30)                       # mask padded tag lanes
        m = jnp.max(logits, axis=-1, keepdims=True)
        z = logits - m
        lse = jnp.log(jnp.sum(jnp.exp(z), axis=-1, keepdims=True))
        # TODO(synk): legacy F.log_softmax(x) without dim picks dim=0 on 3-D inputs;
        # standard tagger semantics (softmax over the tag axis) implemented instead.
        o_ref[t] = z - lse                                             # (Bp, Kp) full-vreg store


# ----------------------------------------------------------------------------
# Full forward pass (matches LSTMTagger.forward)
# ----------------------------------------------------------------------------
def lstm_tagger_forward(sentence, p):
    # embedding lookup (glue)
    embeds = jnp.take(p["embed_w"], sentence, axis=0)                  # (B, T, E)
    # TODO(synk): nn.Dropout(0.3) on embeds and intra-RNN dropout=0.5 treated as identity
    # (deterministic eval); num_layers=1 makes the RNN dropout a no-op anyway.
    x = jnp.transpose(embeds, (1, 0, 2)).astype(jnp.float32)           # (T, B, E) time-major
    T, B, E = x.shape
    H = p["h0_enc"].shape[-1]
    K = p["w_tag"].shape[-1]

    SUB, LANE = 8, 128
    Bp = -(-B // SUB) * SUB                                            # pad batch -> full sublanes
    Kp = -(-K // LANE) * LANE                                          # pad tags  -> full lanes

    x_pad = jnp.zeros((T, Bp, E), jnp.float32).at[:, :B, :].set(x)

    # Fused per-direction gate weights [W_ih; W_hh; W_ch] and block-diagonal two-direction
    # weight so the encoder needs exactly one matmul per timestep.
    w_f = jnp.concatenate([p["w_ih_enc"][0], p["w_hh_enc"][0], p["w_ch_enc"][0]], axis=0)
    w_b = jnp.concatenate([p["w_ih_enc"][1], p["w_hh_enc"][1], p["w_ch_enc"][1]], axis=0)
    z = jnp.zeros_like(w_f)
    w_enc = jnp.concatenate(
        [jnp.concatenate([w_f, z], axis=1), jnp.concatenate([z, w_b], axis=1)], axis=0)

    w_dec = jnp.concatenate([p["w0_dec"], p["w1_dec"], p["w2_dec"]], axis=0)  # (3H, 4H)

    h0e = jnp.broadcast_to(p["h0_enc"][:, None, :], (2, Bp, H))
    c0e = jnp.broadcast_to(p["c0_enc"][:, None, :], (2, Bp, H))
    h0d = jnp.broadcast_to(p["h0_dec"][None, :], (Bp, H))
    c0d = jnp.broadcast_to(p["c0_dec"][None, :], (Bp, H))
    ctx = jnp.broadcast_to(p["ctx_dec"][None, :], (Bp, H))

    w_tag = jnp.zeros((H, Kp), jnp.float32).at[:, :K].set(p["w_tag"])
    b_tag = jnp.zeros((1, Kp), jnp.float32).at[:, :K].set(p["b_tag"])

    vm = pl.BlockSpec(memory_space=pltpu.MemorySpace.VMEM)
    out = pl.pallas_call(
        functools.partial(tagger_kernel, num_tags=K),
        out_shape=jax.ShapeDtypeStruct((T, Bp, Kp), jnp.float32),
        in_specs=[vm] * 12,
        out_specs=vm,
        scratch_shapes=[pltpu.VMEM((Bp, H), jnp.float32)] * 4          # hf, cf, hb, cb
                       + [pltpu.VMEM((T, Bp, H), jnp.float32)] * 2     # ef (fwd/out), eb (bwd)
                       + [pltpu.VMEM((Bp, H), jnp.float32)] * 2,       # hd, cd
    )(x_pad, h0e, c0e, w_enc, h0d, c0d, ctx, w_dec,
      p["w3_dec"], p["w4_dec"], w_tag, b_tag)

    return out[:, :B, :K].transpose(1, 0, 2)                           # (B, T, K) batch-first


if __name__ == "__main__":
    B, T = 2, 8
    EMBED_DIM = 32
    HIDDEN_DIM = 32   # module implies EMBED_DIM == HIDDEN_DIM (decoder weight shapes)
    VOCAB = 50
    TAGSET = 10

    key = jax.random.PRNGKey(0)
    ks = jax.random.split(key, 18)

    sentence = jax.random.randint(ks[0], (B, T), 0, VOCAB, dtype=jnp.int32)

    bound = float(1.0 / (HIDDEN_DIM ** 0.5))
    params = {
        # word_embed_weight (given to the module in __init__)
        "embed_w": jax.random.normal(ks[1], (VOCAB, EMBED_DIM), jnp.float32),
        # encoder: per-direction [h0, c0] and [W_ih, W_hh, W_ch], uniform_() like the module
        "h0_enc": jax.random.uniform(ks[2], (2, HIDDEN_DIM), jnp.float32),
        "c0_enc": jax.random.uniform(ks[3], (2, HIDDEN_DIM), jnp.float32),
        "w_ih_enc": jax.random.uniform(ks[4], (2, EMBED_DIM, 4 * HIDDEN_DIM), jnp.float32),
        "w_hh_enc": jax.random.uniform(ks[5], (2, HIDDEN_DIM, 4 * HIDDEN_DIM), jnp.float32),
        "w_ch_enc": jax.random.uniform(ks[6], (2, HIDDEN_DIM, 4 * HIDDEN_DIM), jnp.float32),
        # decoder: 3 hidden vectors and 5 weights
        "h0_dec": jax.random.uniform(ks[7], (HIDDEN_DIM,), jnp.float32),
        "c0_dec": jax.random.uniform(ks[8], (HIDDEN_DIM,), jnp.float32),
        "ctx_dec": jax.random.uniform(ks[9], (HIDDEN_DIM,), jnp.float32),
        "w0_dec": jax.random.uniform(ks[10], (HIDDEN_DIM, 4 * HIDDEN_DIM), jnp.float32),
        "w1_dec": jax.random.uniform(ks[11], (HIDDEN_DIM, 4 * HIDDEN_DIM), jnp.float32),
        "w2_dec": jax.random.uniform(ks[12], (HIDDEN_DIM, 4 * HIDDEN_DIM), jnp.float32),
        "w3_dec": jax.random.uniform(ks[13], (HIDDEN_DIM, 4 * HIDDEN_DIM), jnp.float32),
        "w4_dec": jax.random.uniform(ks[14], (HIDDEN_DIM, HIDDEN_DIM), jnp.float32),
        # hidden2tag = nn.Linear(HIDDEN_DIM, TAGSET)
        "w_tag": jax.random.uniform(ks[15], (HIDDEN_DIM, TAGSET), jnp.float32,
                                    minval=-bound, maxval=bound),
        "b_tag": jax.random.uniform(ks[16], (1, TAGSET), jnp.float32,
                                    minval=-bound, maxval=bound),
    }

    tag_scores = lstm_tagger_forward(sentence, params)
    tag_scores = jax.block_until_ready(tag_scores)
    assert tag_scores.shape == (B, T, TAGSET)
    assert bool(jnp.all(jnp.isfinite(tag_scores)))
    print("KERNEL_OK")
</pallas_src>

<mosaic_0001>
module attributes {stable_mosaic.version = 11 : i64} {
  func.func @tagger_kernel(%arg0: memref<8x8x32xf32, #tpu.memory_space<vmem>>, %arg1: memref<2x8x32xf32, #tpu.memory_space<vmem>>, %arg2: memref<2x8x32xf32, #tpu.memory_space<vmem>>, %arg3: memref<192x256xf32, #tpu.memory_space<vmem>>, %arg4: memref<8x32xf32, #tpu.memory_space<vmem>>, %arg5: memref<8x32xf32, #tpu.memory_space<vmem>>, %arg6: memref<8x32xf32, #tpu.memory_space<vmem>>, %arg7: memref<96x128xf32, #tpu.memory_space<vmem>>, %arg8: memref<32x128xf32, #tpu.memory_space<vmem>>, %arg9: memref<32x32xf32, #tpu.memory_space<vmem>>, %arg10: memref<32x128xf32, #tpu.memory_space<vmem>>, %arg11: memref<1x128xf32, #tpu.memory_space<vmem>>, %arg12: memref<8x8x128xf32, #tpu.memory_space<vmem>>, %arg13: memref<8x32xf32, #tpu.memory_space<vmem>>, %arg14: memref<8x32xf32, #tpu.memory_space<vmem>>, %arg15: memref<8x32xf32, #tpu.memory_space<vmem>>, %arg16: memref<8x32xf32, #tpu.memory_space<vmem>>, %arg17: memref<8x8x32xf32, #tpu.memory_space<vmem>>, %arg18: memref<8x8x32xf32, #tpu.memory_space<vmem>>, %arg19: memref<8x32xf32, #tpu.memory_space<vmem>>, %arg20: memref<8x32xf32, #tpu.memory_space<vmem>>) attributes {dimension_semantics = [], scalar_prefetch = 0 : i64, scratch_operands = 8 : i64, tpu.core_type = #tpu.core_type<tc>} {
    %c0 = arith.constant 0 : index
    %c0_0 = arith.constant 0 : index
    %c0_1 = arith.constant 0 : index
    %0 = vector.load %arg1[%c0, %c0_0, %c0_1] : memref<2x8x32xf32, #tpu.memory_space<vmem>>, vector<1x8x32xf32>
    %1 = vector.shape_cast %0 : vector<1x8x32xf32> to vector<8x32xf32>
    %c0_2 = arith.constant 0 : index
    %c0_3 = arith.constant 0 : index
    %2 = vector.load %arg13[%c0_2, %c0_3] : memref<8x32xf32, #tpu.memory_space<vmem>>, vector<8x32xf32>
    tpu.vector_store %arg13[%c0_2, %c0_3], %1 {strides = array<i32>} : memref<8x32xf32, #tpu.memory_space<vmem>>, vector<8x32xf32>,
    %c0_4 = arith.constant 0 : index
    %c0_5 = arith.constant 0 : index
    %c0_6 = arith.constant 0 : index
    %3 = vector.load %arg2[%c0_4, %c0_5, %c0_6] : memref<2x8x32xf32, #tpu.memory_space<vmem>>, vector<1x8x32xf32>
    %4 = vector.shape_cast %3 : vector<1x8x32xf32> to vector<8x32xf32>
    %c0_7 = arith.constant 0 : index
    %c0_8 = arith.constant 0 : index
    %5 = vector.load %arg14[%c0_7, %c0_8] : memref<8x32xf32, #tpu.memory_space<vmem>>, vector<8x32xf32>
    tpu.vector_store %arg14[%c0_7, %c0_8], %4 {strides = array<i32>} : memref<8x32xf32, #tpu.memory_space<vmem>>, vector<8x32xf32>,
    %c1 = arith.constant 1 : index
    %c0_9 = arith.constant 0 : index
    %c0_10 = arith.constant 0 : index
    %6 = vector.load %arg1[%c1, %c0_9, %c0_10] : memref<2x8x32xf32, #tpu.memory_space<vmem>>, vector<1x8x32xf32>
    %7 = vector.shape_cast %6 : vector<1x8x32xf32> to vector<8x32xf32>
    %c0_11 = arith.constant 0 : index
    %c0_12 = arith.constant 0 : index
    %8 = vector.load %arg15[%c0_11, %c0_12] : memref<8x32xf32, #tpu.memory_space<vmem>>, vector<8x32xf32>
    tpu.vector_store %arg15[%c0_11, %c0_12], %7 {strides = array<i32>} : memref<8x32xf32, #tpu.memory_space<vmem>>, vector<8x32xf32>,
    %c1_13 = arith.constant 1 : index
    %c0_14 = arith.constant 0 : index
    %c0_15 = arith.constant 0 : index
    %9 = vector.load %arg2[%c1_13, %c0_14, %c0_15] : memref<2x8x32xf32, #tpu.memory_space<vmem>>, vector<1x8x32xf32>
    %10 = vector.shape_cast %9 : vector<1x8x32xf32> to vector<8x32xf32>
    %c0_16 = arith.constant 0 : index
    %c0_17 = arith.constant 0 : index
    %11 = vector.load %arg16[%c0_16, %c0_17] : memref<8x32xf32, #tpu.memory_space<vmem>>, vector<8x32xf32>
    tpu.vector_store %arg16[%c0_16, %c0_17], %10 {strides = array<i32>} : memref<8x32xf32, #tpu.memory_space<vmem>>, vector<8x32xf32>,
    %c0_i32 = arith.constant 0 : i32
    %c8_i32 = arith.constant 8 : i32
    %12 = arith.addi %c0_i32, %c8_i32 : i32
    %c1_i32 = arith.constant 1 : i32
    scf.for %arg21 = %c0_i32 to %12 step %c1_i32  : i32 {
      %c1_i32_53 = arith.constant 1 : i32
      %35 = arith.muli %arg21, %c1_i32_53 : i32
      %c0_i32_54 = arith.constant 0 : i32
      %36 = arith.addi %c0_i32_54, %35 : i32
      %c7_i32 = arith.constant 7 : i32
      %37 = arith.subi %c7_i32, %36 : i32
      %38 = arith.index_cast %36 : i32 to index
      %c0_55 = arith.constant 0 : index
      %c0_56 = arith.constant 0 : index
      %39 = vector.load %arg0[%38, %c0_55, %c0_56] : memref<8x8x32xf32, #tpu.memory_space<vmem>>, vector<1x8x32xf32>
      %40 = vector.shape_cast %39 : vector<1x8x32xf32> to vector<8x32xf32>
      %c0_57 = arith.constant 0 : index
      %c0_58 = arith.constant 0 : index
      %41 = vector.load %arg13[%c0_57, %c0_58] : memref<8x32xf32, #tpu.memory_space<vmem>>, vector<8x32xf32>
      %c0_59 = arith.constant 0 : index
      %c0_60 = arith.constant 0 : index
      %42 = vector.load %arg14[%c0_59, %c0_60] : memref<8x32xf32, #tpu.memory_space<vmem>>, vector<8x32xf32>
      %43 = arith.index_cast %37 : i32 to index
      %c0_61 = arith.constant 0 : index
      %c0_62 = arith.constant 0 : index
      %44 = vector.load %arg0[%43, %c0_61, %c0_62] : memref<8x8x32xf32, #tpu.memory_space<vmem>>, vector<1x8x32xf32>
      %45 = vector.shape_cast %44 : vector<1x8x32xf32> to vector<8x32xf32>
      %c0_63 = arith.constant 0 : index
      %c0_64 = arith.constant 0 : index
      %46 = vector.load %arg15[%c0_63, %c0_64] : memref<8x32xf32, #tpu.memory_space<vmem>>, vector<8x32xf32>
      %c0_65 = arith.constant 0 : index
      %c0_66 = arith.constant 0 : index
      %47 = vector.load %arg16[%c0_65, %c0_66] : memref<8x32xf32, #tpu.memory_space<vmem>>, vector<8x32xf32>
      %48 = tpu.concatenate %40, %41, %42, %45, %46, %47 in 1 : vector<8x32xf32>, vector<8x32xf32>, vector<8x32xf32>, vector<8x32xf32>, vector<8x32xf32>, vector<8x32xf32> -> vector<8x192xf32>
      %c0_67 = arith.constant 0 : index
      %c0_68 = arith.constant 0 : index
      %49 = vector.load %arg3[%c0_67, %c0_68] : memref<192x256xf32, #tpu.memory_space<vmem>>, vector<192x256xf32>
      %cst_69 = arith.constant dense<0.000000e+00> : vector<8x256xf32>
      %50 = tpu.matmul %48, %49, %cst_69 {dimension_numbers = #tpu.dot_dimension_numbers<[1], [0], [0], [1], [0, 0, 1, 1], [], []>} : vector<8x192xf32>, vector<192x256xf32>, vector<8x256xf32> -> vector<8x256xf32>
      %c0_70 = arith.constant 0 : index
      %c0_71 = arith.constant 0 : index
      %51 = vector.load %arg14[%c0_70, %c0_71] : memref<8x32xf32, #tpu.memory_space<vmem>>, vector<8x32xf32>
      %52 = vector.extract_strided_slice %50 {offsets = [0, 0], sizes = [8, 32], strides = [1, 1]} : vector<8x256xf32> to vector<8x32xf32>
      %53 = arith.negf %52 : vector<8x32xf32>
      %54 = math.exp %53 : vector<8x32xf32>
      %cst_72 = arith.constant 1.000000e+00 : f32
      %55 = vector.broadcast %cst_72 : f32 to vector<8x32xf32>
      %56 = arith.addf %55, %54 : vector<8x32xf32>
      %57 = arith.divf %55, %56 : vector<8x32xf32>
      %58 = vector.extract_strided_slice %50 {offsets = [0, 32], sizes = [8, 32], strides = [1, 1]} : vector<8x256xf32> to vector<8x32xf32>
      %59 = arith.negf %58 : vector<8x32xf32>
      %60 = math.exp %59 : vector<8x32xf32>
      %cst_73 = arith.constant 1.000000e+00 : f32
      %61 = vector.broadcast %cst_73 : f32 to vector<8x32xf32>
      %62 = arith.addf %61, %60 : vector<8x32xf32>
      %63 = arith.divf %61, %62 : vector<8x32xf32>
      %64 = vector.extract_strided_slice %50 {offsets = [0, 64], sizes = [8, 32], strides = [1, 1]} : vector<8x256xf32> to vector<8x32xf32>
      %65 = math.tanh %64 : vector<8x32xf32>
      %66 = vector.extract_strided_slice %50 {offsets = [0, 96], sizes = [8, 32], strides = [1, 1]} : vector<8x256xf32> to vector<8x32xf32>
      %67 = arith.negf %66 : vector<8x32xf32>
      %68 = math.exp %67 : vector<8x32xf32>
      %cst_74 = arith.constant 1.000000e+00 : f32
      %69 = vector.broadcast %cst_74 : f32 to vector<8x32xf32>
      %70 = arith.addf %69, %68 : vector<8x32xf32>
      %71 = arith.divf %69, %70 : vector<8x32xf32>
      %72 = arith.mulf %63, %51 : vector<8x32xf32>
      %73 = arith.mulf %57, %65 : vector<8x32xf32>
      %74 = arith.addf %72, %73 : vector<8x32xf32>
      %75 = math.tanh %74 : vector<8x32xf32>
      %76 = arith.mulf %71, %75 : vector<8x32xf32>
      %c0_75 = arith.constant 0 : index
      %c0_76 = arith.constant 0 : index
      %77 = vector.load %arg13[%c0_75, %c0_76] : memref<8x32xf32, #tpu.memory_space<vmem>>, vector<8x32xf32>
      tpu.vector_store %arg13[%c0_75, %c0_76], %76 {strides = array<i32>} : memref<8x32xf32, #tpu.memory_space<vmem>>, vector<8x32xf32>,
      %c0_77 = arith.constant 0 : index
      %c0_78 = arith.constant 0 : index
      %78 = vector.load %arg14[%c0_77, %c0_78] : memref<8x32xf32, #tpu.memory_space<vmem>>, vector<8x32xf32>
      tpu.vector_store %arg14[%c0_77, %c0_78], %74 {strides = array<i32>} : memref<8x32xf32, #tpu.memory_space<vmem>>, vector<8x32xf32>,
      %79 = arith.index_cast %36 : i32 to index
      %c0_79 = arith.constant 0 : index
      %c0_80 = arith.constant 0 : index
      %80 = vector.load %arg17[%79, %c0_79, %c0_80] : memref<8x8x32xf32, #tpu.memory_space<vmem>>, vector<1x8x32xf32>
      %81 = vector.shape_cast %80 : vector<1x8x32xf32> to vector<8x32xf32>
      %82 = vector.shape_cast %76 : vector<8x32xf32> to vector<1x8x32xf32>
      tpu.vector_store %arg17[%79, %c0_79, %c0_80], %82 {strides = array<i32>} : memref<8x8x32xf32, #tpu.memory_space<vmem>>, vector<1x8x32xf32>,
      %c0_81 = arith.constant 0 : index
      %c0_82 = arith.constant 0 : index
      %83 = vector.load %arg16[%c0_81, %c0_82] : memref<8x32xf32, #tpu.memory_space<vmem>>, vector<8x32xf32>
      %84 = vector.extract_strided_slice %50 {offsets = [0, 128], sizes = [8, 32], strides = [1, 1]} : vector<8x256xf32> to vector<8x32xf32>
      %85 = arith.negf %84 : vector<8x32xf32>
      %86 = math.exp %85 : vector<8x32xf32>
      %cst_83 = arith.constant 1.000000e+00 : f32
      %87 = vector.broadcast %cst_83 : f32 to vector<8x32xf32>
      %88 = arith.addf %87, %86 : vector<8x32xf32>
      %89 = arith.divf %87, %88 : vector<8x32xf32>
      %90 = vector.extract_strided_slice %50 {offsets = [0, 160], sizes = [8, 32], strides = [1, 1]} : vector<8x256xf32> to vector<8x32xf32>
      %91 = arith.negf %90 : vector<8x32xf32>
      %92 = math.exp %91 : vector<8x32xf32>
      %cst_84 = arith.constant 1.000000e+00 : f32
      %93 = vector.broadcast %cst_84 : f32 to vector<8x32xf32>
      %94 = arith.addf %93, %92 : vector<8x32xf32>
      %95 = arith.divf %93, %94 : vector<8x32xf32>
      %96 = vector.extract_strided_slice %50 {offsets = [0, 192], sizes = [8, 32], strides = [1, 1]} : vector<8x256xf32> to vector<8x32xf32>
      %97 = math.tanh %96 : vector<8x32xf32>
      %98 = vector.extract_strided_slice %50 {offsets = [0, 224], sizes = [8, 32], strides = [1, 1]} : vector<8x256xf32> to vector<8x32xf32>
      %99 = arith.negf %98 : vector<8x32xf32>
      %100 = math.exp %99 : vector<8x32xf32>
      %cst_85 = arith.constant 1.000000e+00 : f32
      %101 = vector.broadcast %cst_85 : f32 to vector<8x32xf32>
      %102 = arith.addf %101, %100 : vector<8x32xf32>
      %103 = arith.divf %101, %102 : vector<8x32xf32>
      %104 = arith.mulf %95, %83 : vector<8x32xf32>
      %105 = arith.mulf %89, %97 : vector<8x32xf32>
      %106 = arith.addf %104, %105 : vector<8x32xf32>
      %107 = math.tanh %106 : vector<8x32xf32>
      %108 = arith.mulf %103, %107 : vector<8x32xf32>
      %c0_86 = arith.constant 0 : index
      %c0_87 = arith.constant 0 : index
      %109 = vector.load %arg15[%c0_86, %c0_87] : memref<8x32xf32, #tpu.memory_space<vmem>>, vector<8x32xf32>
      tpu.vector_store %arg15[%c0_86, %c0_87], %108 {strides = array<i32>} : memref<8x32xf32, #tpu.memory_space<vmem>>, vector<8x32xf32>,
      %c0_88 = arith.constant 0 : index
      %c0_89 = arith.constant 0 : index
      %110 = vector.load %arg16[%c0_88, %c0_89] : memref<8x32xf32, #tpu.memory_space<vmem>>, vector<8x32xf32>
      tpu.vector_store %arg16[%c0_88, %c0_89], %106 {strides = array<i32>} : memref<8x32xf32, #tpu.memory_space<vmem>>, vector<8x32xf32>,
      %111 = arith.index_cast %37 : i32 to index
      %c0_90 = arith.constant 0 : index
      %c0_91 = arith.constant 0 : index
      %112 = vector.load %arg18[%111, %c0_90, %c0_91] : memref<8x8x32xf32, #tpu.memory_space<vmem>>, vector<1x8x32xf32>
      %113 = vector.shape_cast %112 : vector<1x8x32xf32> to vector<8x32xf32>
      %114 = vector.shape_cast %108 : vector<8x32xf32> to vector<1x8x32xf32>
      tpu.vector_store %arg18[%111, %c0_90, %c0_91], %114 {strides = array<i32>} : memref<8x8x32xf32, #tpu.memory_space<vmem>>, vector<1x8x32xf32>,
    }
    %c8_i32_18 = arith.constant 8 : i32
    %c0_19 = arith.constant 0 : index
    %c0_20 = arith.constant 0 : index
    %c0_21 = arith.constant 0 : index
    %13 = vector.load %arg17[%c0_19, %c0_20, %c0_21] : memref<8x8x32xf32, #tpu.memory_space<vmem>>, vector<8x8x32xf32>
    %c0_22 = arith.constant 0 : index
    %c0_23 = arith.constant 0 : index
    %c0_24 = arith.constant 0 : index
    %14 = vector.load %arg18[%c0_22, %c0_23, %c0_24] : memref<8x8x32xf32, #tpu.memory_space<vmem>>, vector<8x8x32xf32>
    %15 = arith.addf %13, %14 : vector<8x8x32xf32>
    %c0_25 = arith.constant 0 : index
    %c0_26 = arith.constant 0 : index
    %c0_27 = arith.constant 0 : index
    %16 = vector.load %arg17[%c0_25, %c0_26, %c0_27] : memref<8x8x32xf32, #tpu.memory_space<vmem>>, vector<8x8x32xf32>
    tpu.vector_store %arg17[%c0_25, %c0_26, %c0_27], %15 {strides = array<i32>} : memref<8x8x32xf32, #tpu.memory_space<vmem>>, vector<8x8x32xf32>,
    %c0_28 = arith.constant 0 : index
    %c0_29 = arith.constant 0 : index
    %17 = vector.load %arg4[%c0_28, %c0_29] : memref<8x32xf32, #tpu.memory_space<vmem>>, vector<8x32xf32>
    %c0_30 = arith.constant 0 : index
    %c0_31 = arith.constant 0 : index
    %18 = vector.load %arg19[%c0_30, %c0_31] : memref<8x32xf32, #tpu.memory_space<vmem>>, vector<8x32xf32>
    tpu.vector_store %arg19[%c0_30, %c0_31], %17 {strides = array<i32>} : memref<8x32xf32, #tpu.memory_space<vmem>>, vector<8x32xf32>,
    %c0_32 = arith.constant 0 : index
    %c0_33 = arith.constant 0 : index
    %19 = vector.load %arg5[%c0_32, %c0_33] : memref<8x32xf32, #tpu.memory_space<vmem>>, vector<8x32xf32>
    %c0_34 = arith.constant 0 : index
    %c0_35 = arith.constant 0 : index
    %20 = vector.load %arg20[%c0_34, %c0_35] : memref<8x32xf32, #tpu.memory_space<vmem>>, vector<8x32xf32>
    tpu.vector_store %arg20[%c0_34, %c0_35], %19 {strides = array<i32>} : memref<8x32xf32, #tpu.memory_space<vmem>>, vector<8x32xf32>,
    %c0_36 = arith.constant 0 : index
    %c0_37 = arith.constant 0 : index
    %21 = vector.load %arg7[%c0_36, %c0_37] : memref<96x128xf32, #tpu.memory_space<vmem>>, vector<96x128xf32>
    %c0_38 = arith.constant 0 : index
    %c0_39 = arith.constant 0 : index
    %22 = vector.load %arg6[%c0_38, %c0_39] : memref<8x32xf32, #tpu.memory_space<vmem>>, vector<8x32xf32>
    %c0_40 = arith.constant 0 : index
    %c0_41 = arith.constant 0 : index
    %23 = vector.load %arg8[%c0_40, %c0_41] : memref<32x128xf32, #tpu.memory_space<vmem>>, vector<32x128xf32>
    %cst = arith.constant dense<0.000000e+00> : vector<8x128xf32>
    %24 = tpu.matmul %22, %23, %cst {dimension_numbers = #tpu.dot_dimension_numbers<[1], [0], [0], [1], [0, 0, 1, 1], [], []>} : vector<8x32xf32>, vector<32x128xf32>, vector<8x128xf32> -> vector<8x128xf32>
    %c0_42 = arith.constant 0 : index
    %c0_43 = arith.constant 0 : index
    %25 = vector.load %arg9[%c0_42, %c0_43] : memref<32x32xf32, #tpu.memory_space<vmem>>, vector<32x32xf32>
    %c0_44 = arith.constant 0 : index
    %c0_45 = arith.constant 0 : index
    %26 = vector.load %arg10[%c0_44, %c0_45] : memref<32x128xf32, #tpu.memory_space<vmem>>, vector<32x128xf32>
    %cst_46 = arith.constant dense<0.000000e+00> : vector<32x128xf32>
    %27 = tpu.matmul %25, %26, %cst_46 {dimension_numbers = #tpu.dot_dimension_numbers<[1], [0], [0], [1], [0, 0, 1, 1], [], []>} : vector<32x32xf32>, vector<32x128xf32>, vector<32x128xf32> -> vector<32x128xf32>
    %c0_47 = arith.constant 0 : index
    %c0_48 = arith.constant 0 : index
    %28 = vector.load %arg11[%c0_47, %c0_48] : memref<1x128xf32, #tpu.memory_space<vmem>>, vector<1x128xf32>
    %29 = vector.shape_cast %28 : vector<1x128xf32> to vector<1x128xf32>
    %30 = vector.broadcast %29 : vector<1x128xf32> to vector<8x128xf32>
    %31 = tpu.iota {dimensions = array<i32: 1>} : vector<8x128xi32>
    %c10_i32 = arith.constant 10 : i32
    %32 = vector.broadcast %c10_i32 : i32 to vector<8x128xi32>
    %33 = arith.cmpi slt, %31, %32 : vector<8x128xi32>
    %c0_i32_49 = arith.constant 0 : i32
    %c8_i32_50 = arith.constant 8 : i32
    %34 = arith.addi %c0_i32_49, %c8_i32_50 : i32
    %c1_i32_51 = arith.constant 1 : i32
    scf.for %arg21 = %c0_i32_49 to %34 step %c1_i32_51  : i32 {
      %c1_i32_53 = arith.constant 1 : i32
      %35 = arith.muli %arg21, %c1_i32_53 : i32
      %c0_i32_54 = arith.constant 0 : i32
      %36 = arith.addi %c0_i32_54, %35 : i32
      %37 = arith.index_cast %36 : i32 to index
      %c0_55 = arith.constant 0 : index
      %c0_56 = arith.constant 0 : index
      %38 = vector.load %arg17[%37, %c0_55, %c0_56] : memref<8x8x32xf32, #tpu.memory_space<vmem>>, vector<1x8x32xf32>
      %39 = vector.shape_cast %38 : vector<1x8x32xf32> to vector<8x32xf32>
      %c0_57 = arith.constant 0 : index
      %c0_58 = arith.constant 0 : index
      %40 = vector.load %arg19[%c0_57, %c0_58] : memref<8x32xf32, #tpu.memory_space<vmem>>, vector<8x32xf32>
      %c0_59 = arith.constant 0 : index
      %c0_60 = arith.constant 0 : index
      %41 = vector.load %arg20[%c0_59, %c0_60] : memref<8x32xf32, #tpu.memory_space<vmem>>, vector<8x32xf32>
      %42 = tpu.concatenate %39, %40, %41 in 1 : vector<8x32xf32>, vector<8x32xf32>, vector<8x32xf32> -> vector<8x96xf32>
      %cst_61 = arith.constant dense<0.000000e+00> : vector<8x128xf32>
      %43 = tpu.matmul %42, %21, %cst_61 {dimension_numbers = #tpu.dot_dimension_numbers<[1], [0], [0], [1], [0, 0, 1, 1], [], []>} : vector<8x96xf32>, vector<96x128xf32>, vector<8x128xf32> -> vector<8x128xf32>
      %44 = arith.addf %43, %24 : vector<8x128xf32>
      %c0_62 = arith.constant 0 : index
      %c0_63 = arith.constant 0 : index
      %45 = vector.load %arg20[%c0_62, %c0_63] : memref<8x32xf32, #tpu.memory_space<vmem>>, vector<8x32xf32>
      %46 = vector.extract_strided_slice %44 {offsets = [0, 0], sizes = [8, 32], strides = [1, 1]} : vector<8x128xf32> to vector<8x32xf32>
      %47 = arith.negf %46 : vector<8x32xf32>
      %48 = math.exp %47 : vector<8x32xf32>
      %cst_64 = arith.constant 1.000000e+00 : f32
      %49 = vector.broadcast %cst_64 : f32 to vector<8x32xf32>
      %50 = arith.addf %49, %48 : vector<8x32xf32>
      %51 = arith.divf %49, %50 : vector<8x32xf32>
      %52 = vector.extract_strided_slice %44 {offsets = [0, 32], sizes = [8, 32], strides = [1, 1]} : vector<8x128xf32> to vector<8x32xf32>
      %53 = arith.negf %52 : vector<8x32xf32>
      %54 = math.exp %53 : vector<8x32xf32>
      %cst_65 = arith.constant 1.000000e+00 : f32
      %55 = vector.broadcast %cst_65 : f32 to vector<8x32xf32>
      %56 = arith.addf %55, %54 : vector<8x32xf32>
      %57 = arith.divf %55, %56 : vector<8x32xf32>
      %58 = vector.extract_strided_slice %44 {offsets = [0, 64], sizes = [8, 32], strides = [1, 1]} : vector<8x128xf32> to vector<8x32xf32>
      %59 = math.tanh %58 : vector<8x32xf32>
      %60 = vector.extract_strided_slice %44 {offsets = [0, 96], sizes = [8, 32], strides = [1, 1]} : vector<8x128xf32> to vector<8x32xf32>
      %61 = arith.negf %60 : vector<8x32xf32>
      %62 = math.exp %61 : vector<8x32xf32>
      %cst_66 = arith.constant 1.000000e+00 : f32
      %63 = vector.broadcast %cst_66 : f32 to vector<8x32xf32>
      %64 = arith.addf %63, %62 : vector<8x32xf32>
      %65 = arith.divf %63, %64 : vector<8x32xf32>
      %66 = arith.mulf %57, %45 : vector<8x32xf32>
      %67 = arith.mulf %51, %59 : vector<8x32xf32>
      %68 = arith.addf %66, %67 : vector<8x32xf32>
      %69 = math.tanh %68 : vector<8x32xf32>
      %70 = arith.mulf %65, %69 : vector<8x32xf32>
      %c0_67 = arith.constant 0 : index
      %c0_68 = arith.constant 0 : index
      %71 = vector.load %arg19[%c0_67, %c0_68] : memref<8x32xf32, #tpu.memory_space<vmem>>, vector<8x32xf32>
      tpu.vector_store %arg19[%c0_67, %c0_68], %70 {strides = array<i32>} : memref<8x32xf32, #tpu.memory_space<vmem>>, vector<8x32xf32>,
      %c0_69 = arith.constant 0 : index
      %c0_70 = arith.constant 0 : index
      %72 = vector.load %arg20[%c0_69, %c0_70] : memref<8x32xf32, #tpu.memory_space<vmem>>, vector<8x32xf32>
      tpu.vector_store %arg20[%c0_69, %c0_70], %68 {strides = array<i32>} : memref<8x32xf32, #tpu.memory_space<vmem>>, vector<8x32xf32>,
      %cst_71 = arith.constant dense<0.000000e+00> : vector<8x128xf32>
      %73 = tpu.matmul %70, %27, %cst_71 {dimension_numbers = #tpu.dot_dimension_numbers<[1], [0], [0], [1], [0, 0, 1, 1], [], []>} : vector<8x32xf32>, vector<32x128xf32>, vector<8x128xf32> -> vector<8x128xf32>
      %74 = arith.addf %73, %30 : vector<8x128xf32>
      %cst_72 = arith.constant -1.000000e+30 : f32
      %75 = vector.broadcast %cst_72 : f32 to vector<8x128xf32>
      %76 = arith.select %33, %74, %75 : vector<8x128xi1>, vector<8x128xf32>
      %cst_73 = arith.constant dense<0xFF800000> : vector<8xf32>
      %77 = vector.multi_reduction <maximumf>, %76, %cst_73 [1] : vector<8x128xf32> to vector<8xf32>
      %78 = vector.shape_cast %77 : vector<8xf32> to vector<8x1xf32>
      %79 = vector.broadcast %78 : vector<8x1xf32> to vector<8x128xf32>
      %80 = arith.subf %76, %79 : vector<8x128xf32>
      %81 = math.exp %80 : vector<8x128xf32>
      %cst_74 = arith.constant dense<0.000000e+00> : vector<8xf32>
      %82 = vector.multi_reduction <add>, %81, %cst_74 [1] : vector<8x128xf32> to vector<8xf32>
      %83 = vector.shape_cast %82 : vector<8xf32> to vector<8x1xf32>
      %84 = math.log %83 : vector<8x1xf32>
      %85 = vector.broadcast %84 : vector<8x1xf32> to vector<8x128xf32>
      %86 = arith.subf %80, %85 : vector<8x128xf32>
      %87 = arith.index_cast %36 : i32 to index
      %c0_75 = arith.constant 0 : index
      %c0_76 = arith.constant 0 : index
      %88 = vector.load %arg12[%87, %c0_75, %c0_76] : memref<8x8x128xf32, #tpu.memory_space<vmem>>, vector<1x8x128xf32>
      %89 = vector.shape_cast %88 : vector<1x8x128xf32> to vector<8x128xf32>
      %90 = vector.shape_cast %86 : vector<8x128xf32> to vector<1x8x128xf32>
      tpu.vector_store %arg12[%87, %c0_75, %c0_76], %90 {strides = array<i32>} : memref<8x8x128xf32, #tpu.memory_space<vmem>>, vector<1x8x128xf32>,
    }
    %c8_i32_52 = arith.constant 8 : i32
    return
  }
}

</mosaic_0001>

<bundles_post_ra>
// kernel: tpu_custom_call.1
= control target key start
LH: loop header
LB: loop body
LE: loop exit
PB: predicated region body
PF: predicated region fallthrough
CT: control target
= control target key end

     0   :  { %17 = vsyncpa [#allocation11], 0  ;;  %s1674_s0 = inlined_call_operand.hbm [shape: f32[8,8,32], index: 0, kind: input, shape index: {}]   ;;  %s1675_s1 = inlined_call_operand.hbm [shape: f32[2,8,32], index: 1, kind: input, shape index: {}]   ;;  %s1676_s2 = inlined_call_operand.hbm [shape: f32[2,8,32], index: 2, kind: input, shape index: {}]   ;;  %s1677_s3 = inlined_call_operand.hbm [shape: f32[192,256], index: 3, kind: input, shape index: {}]   ;;  %s1678_s4 = inlined_call_operand.hbm [shape: f32[8,32], index: 4, kind: input, shape index: {}]   ;;  %s1679_s5 = inlined_call_operand.vmem [shape: f32[8,32], index: 5, kind: input, shape index: {}]   ;;  %s1680_s6 = inlined_call_operand.hbm [shape: f32[8,32], index: 6, kind: input, shape index: {}]   ;;  %s1681_s7 = inlined_call_operand.hbm [shape: f32[96,128], index: 7, kind: input, shape index: {}]   ;;  %s1682_s8 = inlined_call_operand.hbm [shape: f32[32,128], index: 8, kind: input, shape index: {}]   ;;  %s1683_s9 = inlined_call_operand.hbm [shape: f32[32,32], index: 9, kind: input, shape index: {}]   ;;  %s1684_s10 = inlined_call_operand.hbm [shape: f32[32,128], index: 10, kind: input, shape index: {}]   ;;  %s1685_s11 = inlined_call_operand.vmem [shape: f32[1,128], index: 11, kind: input, shape index: {}]   ;;  %s1686_s12 = inlined_call_operand.hbm [shape: f32[8,8,128], index: 12, kind: output, shape index: {}]  }
   0x1   :  { %18 = vsyncpa [#allocation14], 0 }
   0x2   :  { %19 = vsyncpa [#allocation17], 0 }
   0x3   :  { %20 = vsyncpa [#allocation20], 0 }
   0x4   :  { %21 = vsyncpa [#allocation23], 0 }
   0x5   :  { %22 = vsyncpa [#allocation26], 0 }
   0x6   :  { %23 = vsyncpa [#allocation12], 0  ;;  %s1357_s21 = smov [#allocation13]   ;;  %s1358_s23 = smov [#allocation16]  }
   0x7   :  { %s41_s22 = sshll.u32 %s1357_s21, 4  ;;  %s65_s24 = sshll.u32 %s1358_s23, 4  ;;  %s42_s22 = int_to_ptr.vmem [resolvable:$true] %s41_s22  ;;  %s66_s24 = int_to_ptr.vmem [resolvable:$true] %s65_s24 }
   0x8   :  { %s1115_s25 = scalar_lea.vmem %s42_s22, 256  ;;  %p1120_p1 = scmp.lt.s32.totalorder %s42_s22, %s42_s22 }
   0x9   :  { %p1116_p0 = scmp.ne.s32.totalorder %s42_s22, %s1115_s25  ;;  %p1121_p2 = scmp.lt.s32.totalorder %s1115_s25, %s1115_s25 }
   0xb   :  { %p1122_p3 = por %p1121_p2, %p1120_p1 }
   0xd   :  { %p1123_p4 = pnand %p1122_p3, %p1116_p0 }
   0xf   :  { %1126 = shalt.err (!%p1123_p4)
}
  0x10   :  { %s1359_s26 = smov 128   ;;  %s1360_s27 = smov 8  }
  0x11   :  { %47 = dma.hbm_to_vmem [thread:$0]  %s1675_s1, 256, %s42_s22, [#allocation14], %s1359_s26, %s1359_s26, %s1360_s27  }
  0x12   :  { %s1135_s30 = scalar_lea.vmem %s66_s24, 6144  ;;  %p1140_p6 = scmp.lt.s32.totalorder %s66_s24, %s66_s24 }
  0x13   :  { %p1136_p5 = scmp.ne.s32.totalorder %s66_s24, %s1135_s30  ;;  %p1141_p7 = scmp.lt.s32.totalorder %s1135_s30, %s1135_s30 }
  0x15   :  { %p1142_p8 = por %p1141_p7, %p1140_p6 }
  0x17   :  { %p1143_p9 = pnand %p1142_p8, %p1136_p5 }
  0x19   :  { %1146 = shalt.err (!%p1143_p9)
}
  0x1a   :  { %s1361_s13 = smov 256   ;;  %s1362_s14 = smov 16  }
  0x1b   :  { %71 = dma.hbm_to_vmem [thread:$0]  %s1677_s3, 6144, %s66_s24, [#allocation17], %s1361_s13, %s1361_s13, %s1362_s14  }
  0x1c   :  { %s1363_s17 = smov [#allocation19]   ;;  %s1364_s19 = smov [#allocation22]  }
  0x1d   :  { %s90_s18 = sshll.u32 %s1363_s17, 4  ;;  %s111_s20 = sshll.u32 %s1364_s19, 4  ;;  %s91_s18 = int_to_ptr.vmem [resolvable:$true] %s90_s18  ;;  %s112_s20 = int_to_ptr.vmem [resolvable:$true] %s111_s20 }
  0x1e   :  { %s1155_s1 = scalar_lea.vmem %s91_s18, 128  ;;  %p1160_p11 = scmp.lt.s32.totalorder %s91_s18, %s91_s18 }
  0x1f   :  { %p1156_p10 = scmp.ne.s32.totalorder %s91_s18, %s1155_s1  ;;  %p1161_p12 = scmp.lt.s32.totalorder %s1155_s1, %s1155_s1 }
  0x21   :  { %p1162_p13 = por %p1161_p12, %p1160_p11 }
  0x23   :  { %p1163_p0 = pnand %p1162_p13, %p1156_p10 }
  0x25   :  { %1166 = shalt.err (!%p1163_p0)
}
  0x26   :  { %93 = dma.hbm_to_vmem [thread:$0]  %s1680_s6, 128, %s91_s18, [#allocation20]  }
  0x27   :  { %s1175_s23 = scalar_lea.vmem %s112_s20, 512  ;;  %p1180_p2 = scmp.lt.s32.totalorder %s112_s20, %s112_s20 }
  0x28   :  { %p1176_p1 = scmp.ne.s32.totalorder %s112_s20, %s1175_s23  ;;  %p1181_p3 = scmp.lt.s32.totalorder %s1175_s23, %s1175_s23 }
  0x2a   :  { %p1182_p4 = por %p1181_p3, %p1180_p2 }
  0x2c   :  { %p1183_p5 = pnand %p1182_p4, %p1176_p1 }
  0x2e   :  { %1186 = shalt.err (!%p1183_p5)
}
  0x2f   :  { %117 = dma.hbm_to_vmem [thread:$0]  %s1682_s8, 512, %s112_s20, [#allocation23], %s1359_s26, %s1359_s26, %s1360_s27  }
  0x30   :  { %s1365_s25 = smov [#allocation10]   ;;  %s1366_s29 = smov [#allocation15]  }
  0x31   :  { %s29_s28 = sshll.u32 %s1365_s25, 4  ;;  %s53_s30 = sshll.u32 %s1366_s29, 4  ;;  %s30_s28 = int_to_ptr.vmem [resolvable:$true] %s29_s28  ;;  %s54_s30 = int_to_ptr.vmem [resolvable:$true] %s53_s30 }
  0x32   :  { %s1195_s6 = scalar_lea.vmem %s30_s28, 1024  ;;  %p1200_p7 = scmp.lt.s32.totalorder %s30_s28, %s30_s28 }
  0x33   :  { %p1196_p6 = scmp.ne.s32.totalorder %s30_s28, %s1195_s6  ;;  %p1201_p8 = scmp.lt.s32.totalorder %s1195_s6, %s1195_s6 }
  0x35   :  { %p1202_p9 = por %p1201_p8, %p1200_p7 }
  0x37   :  { %p1203_p10 = pnand %p1202_p9, %p1196_p6 }
  0x39   :  { %1206 = shalt.err (!%p1203_p10)
}
  0x3a   :  { %35 = dma.hbm_to_vmem [thread:$0]  %s1674_s0, 1024, %s30_s28, [#allocation11], %s1359_s26, %s1359_s26, %s1360_s27  }
  0x3b   :  { %s1215_s8 = scalar_lea.vmem %s54_s30, 256  ;;  %p1220_p12 = scmp.lt.s32.totalorder %s54_s30, %s54_s30 }
  0x3c   :  { %p1216_p11 = scmp.ne.s32.totalorder %s54_s30, %s1215_s8  ;;  %p1221_p13 = scmp.lt.s32.totalorder %s1215_s8, %s1215_s8 }
  0x3e   :  { %p1222_p0 = por %p1221_p13, %p1220_p12 }
  0x40   :  { %p1223_p1 = pnand %p1222_p0, %p1216_p11 }
  0x42   :  { %1226 = shalt.err (!%p1223_p1)
}
  0x43   :  { %59 = dma.hbm_to_vmem [thread:$0]  %s1676_s2, 256, %s54_s30, [#allocation14], %s1359_s26, %s1359_s26, %s1360_s27  }
  0x44   :  { %s1367_s17 = smov [#allocation18]   ;;  %s1368_s19 = smov [#allocation21]  }
  0x45   :  { %s78_s18 = sshll.u32 %s1367_s17, 4  ;;  %s99_s20 = sshll.u32 %s1368_s19, 4  ;;  %s79_s18 = int_to_ptr.vmem [resolvable:$true] %s78_s18  ;;  %s100_s20 = int_to_ptr.vmem [resolvable:$true] %s99_s20 }
  0x46   :  { %s1235_s0 = scalar_lea.vmem %s79_s18, 128  ;;  %p1240_p3 = scmp.lt.s32.totalorder %s79_s18, %s79_s18 }
  0x47   :  { %p1236_p2 = scmp.ne.s32.totalorder %s79_s18, %s1235_s0  ;;  %p1241_p4 = scmp.lt.s32.totalorder %s1235_s0, %s1235_s0 }
  0x49   :  { %p1242_p5 = por %p1241_p4, %p1240_p3 }
  0x4b   :  { %p1243_p6 = pnand %p1242_p5, %p1236_p2 }
  0x4d   :  { %1246 = shalt.err (!%p1243_p6)
}
  0x4e   :  { %81 = dma.hbm_to_vmem [thread:$0]  %s1678_s4, 128, %s79_s18, [#allocation17]  }
  0x4f   :  { %s1255_s22 = scalar_lea.vmem %s100_s20, 1536  ;;  %p1260_p8 = scmp.lt.s32.totalorder %s100_s20, %s100_s20 }
  0x50   :  { %p1256_p7 = scmp.ne.s32.totalorder %s100_s20, %s1255_s22  ;;  %p1261_p9 = scmp.lt.s32.totalorder %s1255_s22, %s1255_s22 }
  0x52   :  { %p1262_p10 = por %p1261_p9, %p1260_p8 }
  0x54   :  { %p1263_p11 = pnand %p1262_p10, %p1256_p7 }
  0x56   :  { %1266 = shalt.err (!%p1263_p11)
}
  0x57   :  { %105 = dma.hbm_to_vmem [thread:$0]  %s1681_s7, 1536, %s100_s20, [#allocation20], %s1359_s26, %s1359_s26, %s1360_s27  }
  0x58   :  { %s1369_s3 = smov [#allocation24]   ;;  %s1370_s25 = smov [#allocation25]  }
  0x59   :  { %s123_s24 = sshll.u32 %s1369_s3, 4  ;;  %s135_s28 = sshll.u32 %s1370_s25, 4  ;;  %s124_s24 = int_to_ptr.vmem [resolvable:$true] %s123_s24  ;;  %s136_s28 = int_to_ptr.vmem [resolvable:$true] %s135_s28 }
  0x5a   :  { %s1275_s4 = scalar_lea.vmem %s124_s24, 512  ;;  %p1280_p13 = scmp.lt.s32.totalorder %s124_s24, %s124_s24 }
  0x5b   :  { %p1276_p12 = scmp.ne.s32.totalorder %s124_s24, %s1275_s4  ;;  %p1281_p0 = scmp.lt.s32.totalorder %s1275_s4, %s1275_s4 }
  0x5d   :  { %p1282_p1 = por %p1281_p0, %p1280_p13 }
  0x5f   :  { %p1283_p2 = pnand %p1282_p1, %p1276_p12 }
  0x61   :  { %1286 = shalt.err (!%p1283_p2)
}
  0x62   :  { %129 = dma.hbm_to_vmem [thread:$0]  %s1683_s9, 512, %s124_s24, [#allocation23], %s1359_s26, %s1359_s26, %s1360_s27  }
  0x63   :  { %s1295_s7 = scalar_lea.vmem %s136_s28, 512  ;;  %p1300_p4 = scmp.lt.s32.totalorder %s136_s28, %s136_s28 }
  0x64   :  { %p1296_p3 = scmp.ne.s32.totalorder %s136_s28, %s1295_s7  ;;  %p1301_p5 = scmp.lt.s32.totalorder %s1295_s7, %s1295_s7 }
  0x66   :  { %p1302_p6 = por %p1301_p5, %p1300_p4 }
  0x68   :  { %p1303_p7 = pnand %p1302_p6, %p1296_p3 }
  0x6a   :  { %1306 = shalt.err (!%p1303_p7)
}
  0x6b   :  { %141 = dma.hbm_to_vmem [thread:$0]  %s1684_s10, 512, %s136_s28, [#allocation26], %s1359_s26, %s1359_s26, %s1360_s27  }
  0x6c   :  { %1335 = dma.done.wait [#allocation11], 1024  }
  0x6d   :  { %1336 = vsyncadd [#allocation11], 4294966272 }
  0x6e   :  { %1337 = dma.done.wait [#allocation14], 512  }
  0x6f   :  { %1338 = vsyncadd [#allocation14], 4294966784 }
  0x70   :  { %1339 = dma.done.wait [#allocation17], 6272  }
  0x71   :  { %1340 = vsyncadd [#allocation17], 4294961024 }
  0x72   :  { %1341 = dma.done.wait [#allocation20], 1664  }
  0x73   :  { %1342 = vsyncadd [#allocation20], 4294965632 }
  0x74   :  { %1343 = dma.done.wait [#allocation23], 1024  }
  0x75   :  { %1344 = vsyncadd [#allocation23], 4294966272 }
  0x76   :  { %1345 = dma.done.wait [#allocation26], 512  }
  0x77   :  { %1346 = vsyncadd [#allocation26], 4294966784  ;;  %vm175_vm0 = vcmask 261120   ;;  %v174_v0 = vld [vmem:[#allocation13] sm:$0xff]  ;;  %v177_v1 = vld [vmem:[#allocation15] sm:$0xff]  ;;  %s1502_s9 = smov 0  }
  0x78   :  { %v180_v2 = vld [vmem:[#allocation13 + $0x8] sm:$0xff]  ;;  %176 = vst.msk [vmem:[#allocation2] sm:$0xff] %vm175_vm0, %v174_v0  ;;  %178 = vst.msk [vmem:[#allocation3] sm:$0xff] %vm175_vm0, %v177_v1  ;;  %v183_v3 = vld [vmem:[#allocation15 + $0x8] sm:$0xff] }
  0x79   :  { %181 = vst.msk [vmem:[#allocation4] sm:$0xff] %vm175_vm0, %v180_v2  ;;  %184 = vst.msk [vmem:[#allocation5] sm:$0xff] %vm175_vm0, %v183_v3 }
  0x7a LB: > { %s1371_s10 = smov 32   ;;  %v255_v6 = vld [vmem:[#allocation16 + $0xf8] sm:$0xff]  ;;  %v254_v7 = vld [vmem:[#allocation16 + $0xf0] sm:$0xff]  ;;  %v253_v8 = vld [vmem:[#allocation16 + $0xe8] sm:$0xff]  ;;  %s191_s14 = ssub.s32 7, %s1351_s9  ;;  %vm219_vm1 = vcmask 523264   ;;  %s1351_s9 = sphi %s1502_s9, %s190_s9  }
  0x7b   : > { %275 = vmatprep.subr.mxu0 %v255_v6  ;;  %v252_v10 = vld [vmem:[#allocation16 + $0xe0] sm:$0xff]  ;;  %v251_v11 = vld [vmem:[#allocation16 + $0xd8] sm:$0xff]  ;;  %s1515_s8 = sshll.u32 %s191_s14, 3  ;;  %v250_v12 = vld [vmem:[#allocation16 + $0xd0] sm:$0xff]  ;;  %s1372_s15 = smov 64   ;;  %vm221_vm2 = vcmask 785408  }
  0x7c   : > { %276 = vmatpush1.msra.mxu0 %v254_v7  ;;  %v249_v13 = vld [vmem:[#allocation16 + $0xc8] sm:$0xff]  ;;  %s198_s16 = scalar_lea.vmem [#allocation10], %s1515_s8  ;;  %v248_v15 = vld [vmem:[#allocation16 + $0xc0] sm:$0xff]  ;;  %s1373_s17 = smov 96   ;;  %v247_v16 = vld [vmem:[#allocation16 + $0xb8] sm:$0xff] }
  0x7d   : > { %277 = vmatprep.subr.mxu0 %v253_v8  ;;  %v199_v14 = vld [vmem:[%s198_s16] sm:$0xff]  ;;  %v245_v18 = vld [vmem:[#allocation16 + $0xa8] sm:$0xff]  ;;  %v244_v19 = vld [vmem:[#allocation16 + $0xa0] sm:$0xff]  ;;  %s929_s18 = sshll.u32 %s1351_s9, 3  ;;  %s424_s0 = scalar_lea.vmem [#allocation7], %s1515_s8 }
  0x7e   : > { %278 = vmatpush1.msra.mxu0 %v252_v10  ;;  %v246_v17 = vld [vmem:[#allocation16 + $0xb0] sm:$0xff]  ;;  %v243_v20 = vld [vmem:[#allocation16 + $0x98] sm:$0xff]  ;;  %v241_v22 = vld [vmem:[#allocation16 + $0x88] sm:$0xff]  ;;  %s193_s19 = scalar_lea.vmem [#allocation10], %s929_s18  ;;  %s383_s20 = scalar_lea.vmem [#allocation6], %s929_s18 }
  0x7f   : > { %v195_v4 = vld [vmem:[#allocation2] sm:$0xff]  ;;  %v1512_v9 = vld [vmem:[#allocation3] sm:$0xff]  ;;  %279 = vmatprep.subr.mxu0 %v251_v11  ;;  %v240_v23 = vld [vmem:[#allocation16 + $0x80] sm:$0xff]  ;;  %s190_s9 = sadd.s32 1, %s1351_s9  }
  0x80   : > { %v1507_v5 = vld [vmem:[#allocation5] sm:$0xff]  ;;  %203 = vrot.lane.b32.xlu0 %v195_v4, %s1371_s10  ;;  %280 = vmatpush1.msra.mxu0 %v250_v12  ;;  %v242_v21 = vld [vmem:[#allocation16 + $0x90] sm:$0xff]  ;;  %v239_v24 = vld [vmem:[#allocation16 + $0x78] sm:$0xff]  ;;  %p187_p8 = scmp.ge.s32.totalorder %s190_s9, 8  }
  0x81   : > { %215 = vrot.lane.b32.xlu1 %v1507_v5, %s1371_s10  ;;  %281 = vmatprep.subr.mxu0 %v249_v13  ;;  %v238_v25 = vld [vmem:[#allocation16 + $0x70] sm:$0xff]  ;;  %v237_v26 = vld [vmem:[#allocation16 + $0x68] sm:$0xff]  ;;  %v236_v27 = vld [vmem:[#allocation16 + $0x60] sm:$0xff]  ;;  %vm1375_vm3 = vmmov (%p187_p8), 0   ;;  %s1620_s2 = smov (%p187_p8), 0  }
  0x82   : > { %282 = vmatpush1.msra.mxu0 %v248_v15  ;;  %v235_v28 = vld [vmem:[#allocation16 + $0x58] sm:$0xff]  ;;  %v234_v29 = vld [vmem:[#allocation16 + $0x50] sm:$0xff]  ;;  %v233_v30 = vld [vmem:[#allocation16 + $0x48] sm:$0xff] }
  0x83   : > { %283 = vmatprep.subr.mxu0 %v247_v16  ;;  %v232_v31 = vld [vmem:[#allocation16 + $0x40] sm:$0xff]  ;;  %v231_v32 = vld [vmem:[#allocation16 + $0x38] sm:$0xff]  ;;  %v230_v33 = vld [vmem:[#allocation16 + $0x30] sm:$0xff] }
  0x84   : > { %207 = vrot.lane.b32.xlu0 %v1512_v9, %s1372_s15  ;;  %284 = vmatpush1.msra.mxu0 %v246_v17  ;;  %v229_v34 = vld [vmem:[#allocation16 + $0x28] sm:$0xff]  ;;  %v228_v35 = vld [vmem:[#allocation16 + $0x20] sm:$0xff]  ;;  %v227_v36 = vld [vmem:[#allocation16 + $0x18] sm:$0xff] }
  0x85   : > { %211 = vrot.lane.b32.xlu1 %v199_v14, %s1373_s17  ;;  %285 = vmatprep.subr.mxu0 %v245_v18  ;;  %v226_v37 = vld [vmem:[#allocation16 + $0x10] sm:$0xff]  ;;  %v225_v38 = vld [vmem:[#allocation16 + $0x8] sm:$0xff]  ;;  %v224_v39 = vld [vmem:[#allocation16] sm:$0xff] }
  0x86   : > { %286 = vmatpush1.msra.mxu0 %v244_v19  ;;  %v271_v40 = vld [vmem:[#allocation16 + $0x178] sm:$0xff]  ;;  %v270_v41 = vld [vmem:[#allocation16 + $0x170] sm:$0xff]  ;;  %v269_v42 = vld [vmem:[#allocation16 + $0x168] sm:$0xff] }
  0x87   : > { %287 = vmatprep.subr.mxu0 %v243_v20  ;;  %v268_v43 = vld [vmem:[#allocation16 + $0x160] sm:$0xff]  ;;  %v267_v44 = vld [vmem:[#allocation16 + $0x158] sm:$0xff]  ;;  %v266_v45 = vld [vmem:[#allocation16 + $0x150] sm:$0xff] }
  0x88   : > { %288 = vmatpush1.msra.mxu0 %v242_v21  ;;  %v265_v46 = vld [vmem:[#allocation16 + $0x148] sm:$0xff]  ;;  %v264_v47 = vld [vmem:[#allocation16 + $0x140] sm:$0xff]  ;;  %v263_v48 = vld [vmem:[#allocation16 + $0x138] sm:$0xff] }
  0x89   : > { %289 = vmatprep.subr.mxu0 %v241_v22  ;;  %v262_v49 = vld [vmem:[#allocation16 + $0x130] sm:$0xff]  ;;  %v261_v50 = vld [vmem:[#allocation16 + $0x128] sm:$0xff]  ;;  %v260_v51 = vld [vmem:[#allocation16 + $0x120] sm:$0xff] }
  0x8a   : > { %290 = vmatpush1.msra.mxu0 %v240_v23  ;;  %v259_v52 = vld [vmem:[#allocation16 + $0x118] sm:$0xff]  ;;  %v258_v53 = vld [vmem:[#allocation16 + $0x110] sm:$0xff]  ;;  %v257_v54 = vld [vmem:[#allocation16 + $0x108] sm:$0xff] }
  0x8b   : > { %291 = vmatprep.subr.mxu0 %v239_v24  ;;  %v256_v55 = vld [vmem:[#allocation16 + $0x100] sm:$0xff]  ;;  %v194_v59 = vld [vmem:[%s193_s19] sm:$0xff] }
  0x8c   : > { %292 = vmatpush1.msra.mxu0 %v238_v25  ;;  %v200_v56 = vld [vmem:[#allocation4] sm:$0xff] }
  0x8d   : > { %293 = vmatprep.subr.mxu0 %v237_v26 }
  0x8e   : > { %294 = vmatpush1.msra.mxu0 %v236_v27 }
  0x8f   : > { %295 = vmatprep.subr.mxu0 %v235_v28 }
  0x90   : > { %296 = vmatpush1.msra.mxu0 %v234_v29 }
  0x91   : > { %297 = vmatprep.subr.mxu0 %v233_v30 }
  0x92   : > { %298 = vmatpush1.msra.mxu0 %v232_v31 }
  0x93   : > { %299 = vmatprep.subr.mxu0 %v231_v32 }
  0x94   : > { %300 = vmatpush1.msra.mxu0 %v230_v33 }
  0x95   : > { %301 = vmatprep.subr.mxu0 %v229_v34 }
  0x96   : > { %302 = vmatpush1.msra.mxu0 %v228_v35 }
  0x97   : > { %303 = vmatprep.subr.mxu0 %v227_v36  ;;  %v559_v36 = vld [vmem:[#allocation25 + $0x18] sm:$0xff] (%p187_p8) }
  0x98   : > { %304 = vmatpush1.msra.mxu0 %v226_v37  ;;  %986 = vmatprep.subr.mxu1 (%p187_p8), %v559_v36 }
  0x99   : > { %305 = vmatprep.subr.mxu0 %v225_v38  ;;  %987 = vmatpush3.msra.mxu1 (%p187_p8), %v559_v36 }
  0x9a   : > { %306 = vmatpush1.msra.mxu0 %v224_v39 }
  0x9b   : > { %323 = vmatprep.subr.mxu0 %v271_v40 }
  0x9c   : > { %324 = vmatpush2.msra.mxu0 %v270_v41 }
  0x9d   : > { %325 = vmatprep.subr.mxu0 %v269_v42  ;;  %v1374_v42 = vmov (%p187_p8), 0.0  }
  0x9e   : > { %326 = vmatpush2.msra.mxu0 %v268_v43 }
  0x9f   : > { %327 = vmatprep.subr.mxu0 %v267_v44 }
  0xa0   : > { %328 = vmatpush2.msra.mxu0 %v266_v45 }
  0xa1   : > { %329 = vmatprep.subr.mxu0 %v265_v46 }
  0xa2   : > { %330 = vmatpush2.msra.mxu0 %v264_v47 }
  0xa3   : > { %331 = vmatprep.subr.mxu0 %v263_v48 }
  0xa4   : > { %332 = vmatpush2.msra.mxu0 %v262_v49 }
  0xa5   : > { %333 = vmatprep.subr.mxu0 %v261_v50 }
  0xa6   : > { %334 = vmatpush2.msra.mxu0 %v260_v51 }
  0xa7   : > { %335 = vmatprep.subr.mxu0 %v259_v52 }
  0xa8   : > { %336 = vmatpush2.msra.mxu0 %v258_v53 }
  0xa9   : > { %337 = vmatprep.subr.mxu0 %v257_v54 }
  0xaa   : > { %338 = vmatpush2.msra.mxu0 %v256_v55 }
  0xab   :  { %975 = vmatprep.subr.mxu0 (%p187_p8), %v1374_v42 }
  0xf2   : > { %v204_v57 = vpop.permute.xlu0 %203 }
  0xf3   : > { %v216_v58 = vpop.permute.xlu1 %215  ;;  %v218_v61 = vsel %vm175_vm0, %v194_v59, %v204_v57 }
  0xf4   : > { %v223_v60 = vsel %vm175_vm0, %v200_v56, %v216_v58 }
  0xf5   : > { %931 = vmatprep.mubr.msk.f32.mxu0 %vm219_vm1, %v223_v60  ;;  %v458_v60 = vld [vmem:[#allocation18] sm:$0xff] (%p187_p8) }
  0xf6   : > { %v208_v62 = vpop.permute.xlu0 %207  ;;  %459 = vst.msk [vmem:[#allocation8] sm:$0xff] (%p187_p8), %vm175_vm0, %v458_v60 }
  0xf7   : > { %v220_v63 = vsel %vm219_vm1, %v218_v61, %v208_v62  ;;  %v212_v0 = vpop.permute.xlu1 %211 }
  0xf8   : > { %v222_v1 = vsel %vm221_vm2, %v220_v63, %v212_v0  ;;  %v460_v63 = vld [vmem:[%s1679_s5] sm:$0xff] (%p187_p8) }
  0xf9   : > { %340 = vmatmul.mubr.f32.vlgmr.msra.gmra.mxu0 %v222_v1  ;;  %v1564_v0 = vld [vmem:[#allocation21] sm:$0xff] (%p187_p8)  ;;  %v1566_v1 = vld [vmem:[#allocation21 + $0x8] sm:$0xff] (%p187_p8)  ;;  %461 = vst.msk [vmem:[#allocation9] sm:$0xff] (%p187_p8), %vm175_vm0, %v460_v63 }
  0xfa   :  { %983 = vmatprep.mubr.msk.f32.mxu0 (%p187_p8), %vm1375_vm3, %v1374_v42 }
 0x1b9   : > { %v341_v2 = vpop.f32.mrf.mxu0 }
 0x1ba   : > { %1079 = vtanh.f32 %v341_v2  ;;  %v932_v7 = vmul.f32 -1.442695, %v341_v2  ;;  %v1572_v2 = vld [vmem:[#allocation21 + $0x10] sm:$0xff] (%p187_p8) }
 0x1bb   : > { %v343_v3 = vpop.f32.mrf.mxu0 }
 0x1bc   : > { %1081 = vtanh.f32 %v343_v3  ;;  %v933_v8 = vmul.f32 -1.442695, %v343_v3  ;;  %v1574_v3 = vld [vmem:[#allocation21 + $0x18] sm:$0xff] (%p187_p8) }
 0x1bd   : > { %1083 = vpow2.f32 %v932_v7  ;;  %v1582_v7 = vld [vmem:[#allocation21 + $0x30] sm:$0xff] (%p187_p8) }
 0x1be   : > { %1085 = vpow2.f32 %v933_v8  ;;  %v1584_v8 = vld [vmem:[#allocation21 + $0x38] sm:$0xff] (%p187_p8) }
 0x1c7   : > { %v1080_v4 = vpop.eup %1079 }
 0x1c8   : > { %358 = vrot.lane.b32.xlu0 %v1080_v4, %s1372_s15  ;;  %v1576_v4 = vld [vmem:[#allocation21 + $0x20] sm:$0xff] (%p187_p8) }
 0x1c9   : > { %v1082_v6 = vpop.eup %1081 }
 0x1ca   : > { %399 = vrot.lane.b32.xlu1 %v1082_v6, %s1372_s15  ;;  %v1084_v10 = vpop.eup %1083  ;;  %v1580_v6 = vld [vmem:[#allocation21 + $0x28] sm:$0xff] (%p187_p8) }
 0x1cb   : > { %v1086_v11 = vpop.eup %1085  ;;  %v349_v12 = vadd.f32 1.0, %v1084_v10  ;;  %v1586_v10 = vld [vmem:[#allocation21 + $0x40] sm:$0xff] (%p187_p8) }
 0x1cc   : > { %353 = vrot.lane.b32.xlu0 %v1512_v9, %s1371_s10  ;;  %v389_v13 = vadd.f32 1.0, %v1086_v11  ;;  %v1588_v11 = vld [vmem:[#allocation21 + $0x48] sm:$0xff] (%p187_p8) }
 0x1cd   : > { %1087 = vrcp.f32 %v349_v12  ;;  %v1590_v12 = vld [vmem:[#allocation21 + $0x50] sm:$0xff] (%p187_p8) }
 0x1ce   : > { %394 = vrot.lane.b32.xlu1 %v1507_v5, %s1371_s10  ;;  %1089 = vrcp.f32 %v389_v13  ;;  %v1592_v13 = vld [vmem:[#allocation21 + $0x58] sm:$0xff] (%p187_p8) }
 0x1da   : > { %v1088_v14 = vpop.eup %1087 }
 0x1db   : > { %v1090_v17 = vpop.eup %1089 }
 0x23a   : > { %v359_v15 = vpop.permute.xlu0 %358 }
 0x23b   : > { %v361_v16 = vmul.f32 %v1088_v14, %v359_v15  ;;  %v478_v15 = vld [vmem:[#allocation22 + $0x18] sm:$0xff] (%p187_p8) }
 0x23c   : > { %v400_v18 = vpop.permute.xlu1 %399  ;;  %976 = vmatpush3.msra.mxu0 (%p187_p8), %v478_v15 }
 0x23d   : > { %363 = vrot.lane.b32.xlu0 %v361_v16, %s1371_s10  ;;  %v402_v9 = vmul.f32 %v1090_v17, %v400_v18  ;;  %v557_v16 = vld [vmem:[#allocation25 + $0x8] sm:$0xff] (%p187_p8)  ;;  %977 = vmatprep.subr.mxu0 (%p187_p8), %v1374_v42  ;;  %v556_v18 = vld [vmem:[#allocation25] sm:$0xff] (%p187_p8) }
 0x23e   : > { %v354_v5 = vpop.permute.xlu0 %353 }
 0x23f   : > { %404 = vrot.lane.b32.xlu1 %v402_v9, %s1371_s10  ;;  %v356_v19 = vmul.f32 %v1088_v14, %v354_v5  ;;  %v476_v9 = vld [vmem:[#allocation22 + $0x8] sm:$0xff] (%p187_p8)  ;;  %v552_v5 = vld [vmem:[#allocation24] sm:$0xff] (%p187_p8) }
 0x240   : > { %v395_v20 = vpop.permute.xlu1 %394  ;;  %994 = vmatprep.mubr.msk.f32.mxu1 (%p187_p8), %vm175_vm0, %v552_v5 }
 0x241   : > { %v397_v23 = vmul.f32 %v1090_v17, %v395_v20  ;;  %v475_v20 = vld [vmem:[#allocation22] sm:$0xff] (%p187_p8) }
 0x2af   : > { %v364_v21 = vpop.permute.xlu0 %363 }
 0x2b0   : > { %v366_v22 = vadd.f32 %v364_v21, %v356_v19  ;;  %v553_v19 = vld [vmem:[#allocation24 + $0x8] sm:$0xff] (%p187_p8)  ;;  %v554_v21 = vld [vmem:[#allocation24 + $0x10] sm:$0xff] (%p187_p8) }
 0x2b1   : > { %v405_v24 = vpop.permute.xlu1 %404 }
 0x2b2   : > { %1091 = vtanh.f32 %v366_v22  ;;  %v407_v25 = vadd.f32 %v405_v24, %v397_v23  ;;  %v555_v23 = vld [vmem:[#allocation24 + $0x18] sm:$0xff] (%p187_p8)  ;;  %v664_v24 = vlaneseq (%p187_p8) }
 0x2b4   : > { %1093 = vtanh.f32 %v407_v25 }
 0x2bf   : > { %v1092_v26 = vpop.eup %1091 }
 0x2c0   : > { %369 = vrot.lane.b32.xlu0 %v1092_v26, %s1372_s15  ;;  %v1607_v26 = vld [vmem:[%s1685_s11] ss:$0 sm:$0xff] (%p187_p8) }
 0x2c1   : > { %v1094_v27 = vpop.eup %1093 }
 0x2c2   : > { %410 = vrot.lane.b32.xlu1 %v1094_v27, %s1372_s15 }
 0x2c6   : > { %379 = vrot.lane.b32.xlu1 %v366_v22, %s1373_s17  ;;  %v474_v22 = vld [vmem:[#allocation19] sm:$0xff] (%p187_p8) }
 0x2ca   : > { %420 = vrot.lane.b32.xlu1 %v407_v25, %s1373_s17  ;;  %v1602_v25 = vand.u32 (%p187_p8), 127, %v664_v24 }
 0x2cc   :  { %vm666_vm4 = vcmp.lt.s32.totalorder (%p187_p8), %v1602_v25, 10 }
 0x332   : > { %v370_v28 = vpop.permute.xlu0 %369 }
 0x333   : > { %v372_v29 = vmul.f32 %v1088_v14, %v370_v28  ;;  %v558_v14 = vld [vmem:[#allocation25 + $0x10] sm:$0xff] (%p187_p8) }
 0x334   : > { %v411_v30 = vpop.permute.xlu1 %410  ;;  %988 = vmatprep.subr.mxu1 (%p187_p8), %v558_v14 }
 0x335   : > { %374 = vrot.lane.b32.xlu0 %v372_v29, %s1371_s10  ;;  %v413_v31 = vmul.f32 %v1090_v17, %v411_v30  ;;  %v477_v17 = vld [vmem:[#allocation22 + $0x10] sm:$0xff] (%p187_p8)  ;;  %989 = vmatpush3.msra.mxu1 (%p187_p8), %v558_v14 }
 0x336   :  { %990 = vmatprep.subr.mxu1 (%p187_p8), %v557_v16  ;;  %978 = vmatpush3.msra.mxu0 (%p187_p8), %v477_v17 }
 0x337   :  { %991 = vmatpush3.msra.mxu1 (%p187_p8), %v557_v16  ;;  %979 = vmatprep.subr.mxu0 (%p187_p8), %v1374_v42 }
 0x338   : > { %v380_v32 = vpop.permute.xlu1 %379  ;;  %992 = vmatprep.subr.mxu1 (%p187_p8), %v556_v18  ;;  %980 = vmatpush3.msra.mxu0 (%p187_p8), %v476_v9 }
 0x339   : > { %415 = vrot.lane.b32.xlu0 %v413_v31, %s1371_s10  ;;  %382 = vst.msk [vmem:[#allocation3] sm:$0xff] %vm175_vm0, %v380_v32  ;;  %993 = vmatpush3.msra.mxu1 (%p187_p8), %v556_v18 }
 0x33a   :  { %981 = vmatprep.subr.mxu0 (%p187_p8), %v1374_v42  ;;  %995 = vmatmul.mubr.msk.f32.vlgmr.msra.gmra.mxu1 (%p187_p8), %vm175_vm0, %v553_v19 }
 0x33b   :  { %982 = vmatpush3.msra.mxu0 (%p187_p8), %v475_v20  ;;  %997 = vmatprep.mubr.msk.f32.mxu1 (%p187_p8), %vm175_vm0, %v554_v21 }
 0x33c   : > { %v421_v33 = vpop.permute.xlu1 %420  ;;  %984 = vmatmul.mubr.msk.f32.vlgmr.msra.gmra.mxu0 (%p187_p8), %vm175_vm0, %v474_v22 }
 0x33d   : > { %423 = vst.msk [vmem:[#allocation5] sm:$0xff] %vm175_vm0, %v421_v33 }
 0x33e   :  { %998 = vmatmul.mubr.msk.f32.gmra.mxu1 (%p187_p8), %vm175_vm0, %v555_v23 }
 0x3a7   : > { %v375_v34 = vpop.permute.xlu0 %374 }
 0x3a8   : > { %377 = vst.msk [vmem:[#allocation2] sm:$0xff] %vm175_vm0, %v375_v34  ;;  %384 = vst.msk [vmem:[%s383_s20] sm:$0xff] %vm175_vm0, %v375_v34  ;;  %189 = sbr.rel (!%p187_p8) target bundleno = 122 (0x7a), region = 130 }
 0x3ab   : > { %v416_v35 = vpop.permute.xlu0 %415 }
 0x3ac   : > { %418 = vst.msk [vmem:[#allocation4] sm:$0xff] %vm175_vm0, %v416_v35  ;;  %425 = vst.msk [vmem:[%s424_s0] sm:$0xff] %vm175_vm0, %v416_v35 }
 0x3af   :  { %v426_v37 = vld [vmem:[#allocation6] sm:$0xff]  ;;  %v427_v38 = vld [vmem:[#allocation6 + $0x8] sm:$0xff]  ;;  %v428_v39 = vld [vmem:[#allocation6 + $0x10] sm:$0xff] }
 0x3b0   :  { %v429_v40 = vld [vmem:[#allocation6 + $0x18] sm:$0xff]  ;;  %v430_v41 = vld [vmem:[#allocation6 + $0x20] sm:$0xff]  ;;  %v431_v43 = vld [vmem:[#allocation6 + $0x28] sm:$0xff] }
 0x3b1   :  { %v432_v44 = vld [vmem:[#allocation6 + $0x30] sm:$0xff]  ;;  %v433_v45 = vld [vmem:[#allocation6 + $0x38] sm:$0xff] }
 0x3b3   :  { %v434_v46 = vld [vmem:[#allocation7] sm:$0xff]  ;;  %v435_v47 = vld [vmem:[#allocation7 + $0x8] sm:$0xff]  ;;  %v436_v48 = vld [vmem:[#allocation7 + $0x10] sm:$0xff] }
 0x3b4   :  { %v437_v49 = vld [vmem:[#allocation7 + $0x18] sm:$0xff]  ;;  %v438_v50 = vld [vmem:[#allocation7 + $0x20] sm:$0xff]  ;;  %v439_v51 = vld [vmem:[#allocation7 + $0x28] sm:$0xff]  ;;  %v442_v52 = vadd.f32 %v434_v46, %v426_v37  ;;  %v443_v53 = vadd.f32 %v435_v47, %v427_v38  ;;  %v444_v54 = vadd.f32 %v436_v48, %v428_v39 }
 0x3b5   :  { %v440_v55 = vld [vmem:[#allocation7 + $0x30] sm:$0xff]  ;;  %v441_v56 = vld [vmem:[#allocation7 + $0x38] sm:$0xff]  ;;  %v445_v57 = vadd.f32 %v437_v49, %v429_v40  ;;  %v446_v58 = vadd.f32 %v438_v50, %v430_v41  ;;  %v447_v59 = vadd.f32 %v439_v51, %v431_v43 }
 0x3b6   :  { %v448_v61 = vadd.f32 %v440_v55, %v432_v44  ;;  %v449_v62 = vadd.f32 %v441_v56, %v433_v45  ;;  %450 = vst.msk [vmem:[#allocation6] sm:$0xff] %vm175_vm0, %v442_v52  ;;  %451 = vst.msk [vmem:[#allocation6 + $0x8] sm:$0xff] %vm175_vm0, %v443_v53 }
 0x3b7   :  { %452 = vst.msk [vmem:[#allocation6 + $0x10] sm:$0xff] %vm175_vm0, %v444_v54  ;;  %453 = vst.msk [vmem:[#allocation6 + $0x18] sm:$0xff] %vm175_vm0, %v445_v57 }
 0x3b8   :  { %454 = vst.msk [vmem:[#allocation6 + $0x20] sm:$0xff] %vm175_vm0, %v446_v58  ;;  %455 = vst.msk [vmem:[#allocation6 + $0x28] sm:$0xff] %vm175_vm0, %v447_v59 }
 0x3b9   :  { %456 = vst.msk [vmem:[#allocation6 + $0x30] sm:$0xff] %vm175_vm0, %v448_v61  ;;  %457 = vst.msk [vmem:[#allocation6 + $0x38] sm:$0xff] %vm175_vm0, %v449_v62 }
 0x3fa   :  { %v1610_v27 = vpop.f32.mrf.mxu1 }
 0x3fc   :  { %v1612_v28 = vpop.f32.mrf.mxu0  ;;  %v1614_v29 = vpop.f32.mrf.mxu1 }
 0x3fe   :  { %v985_v30 = vpop.f32.mrf.mxu0  ;;  %v1616_v31 = vpop.f32.mrf.mxu1 }
 0x400   :  { %v1618_v32 = vpop.f32.mrf.mxu1 }
 0x401 LB: > { %v676_v33 = vld [vmem:[#allocation8] sm:$0xff]  ;;  %s1376_s11 = smov 32   ;;  %v1377_v34 = vmov 0.0   ;;  %v677_v35 = vld [vmem:[#allocation9] sm:$0xff]  ;;  %vm1378_vm5 = vmmov 0   ;;  %s1379_s23 = smov 64   ;;  %s1355_s2 = sphi %s1620_s2, %s672_s2  }
 0x402   : > { %679 = vrot.lane.b32.xlu0 %v676_v33, %s1376_s11  ;;  %1000 = vmatprep.subr.mxu0 %v1377_v34  ;;  %s940_s3 = sshll.u32 %s1355_s2, 3  ;;  %s1380_s25 = smov 96  }
 0x403   : > { %1001 = vmatpush3.msra.mxu0 %v1592_v13  ;;  %1024 = vmatprep.mubr.msk.f32.mxu0 %vm1378_vm5, %v1377_v34  ;;  %s674_s24 = scalar_lea.vmem [#allocation6], %s940_s3  ;;  %s883_s28 = scalar_lea.vmem [#allocation27], %s940_s3 }
 0x404   : > { %1002 = vmatprep.subr.mxu0 %v1377_v34  ;;  %1027 = vmatprep.subr.mxu1 %v1377_v34  ;;  %v675_v37 = vld [vmem:[%s674_s24] sm:$0xff]  ;;  %s672_s2 = sadd.s32 1, %s1355_s2  }
 0x405   : > { %1003 = vmatpush3.msra.mxu0 %v1590_v12  ;;  %1028 = vmatpush3.msra.mxu1 %v1616_v31  ;;  %p669_p9 = scmp.ge.s32.totalorder %s672_s2, 8  }
 0x406   : > { %683 = vrot.lane.b32.xlu0 %v677_v35, %s1379_s23  ;;  %1004 = vmatprep.subr.mxu0 %v1377_v34  ;;  %s1381_s4 = smov (%p669_p9), [#allocation27]  }
 0x407   : > { %1005 = vmatpush3.msra.mxu0 %v1588_v11  ;;  %1029 = vmatprep.subr.mxu1 %v1377_v34  ;;  %s890_s29 = sshll.u32 (%p669_p9), %s1381_s4, 4  ;;  %s891_s29 = int_to_ptr.vmem [resolvable:$true] %s890_s29 }
 0x408   : > { %1006 = vmatprep.subr.mxu0 %v1377_v34  ;;  %1030 = vmatpush3.msra.mxu1 %v1618_v32  ;;  %s1307_s30 = scalar_lea.vmem (%p669_p9), %s891_s29, 1024  ;;  %p1312_p11 = scmp.lt.s32.totalorder (%p669_p9), %s891_s29, %s891_s29 }
 0x409   : > { %1007 = vmatpush3.msra.mxu0 %v1586_v10  ;;  %1031 = vmatprep.subr.mxu1 %v1377_v34  ;;  %p1308_p10 = scmp.ne.s32.totalorder (%p669_p9), %s891_s29, %s1307_s30  ;;  %p1313_p12 = scmp.lt.s32.totalorder (%p669_p9), %s1307_s30, %s1307_s30 }
 0x40a   : > { %1008 = vmatprep.subr.mxu0 %v1377_v34  ;;  %1032 = vmatpush3.msra.mxu1 %v1610_v27 }
 0x40b   : > { %1009 = vmatpush3.msra.mxu0 %v1584_v8  ;;  %1033 = vmatprep.subr.mxu1 %v1377_v34  ;;  %p1314_p13 = por (%p669_p9), %p1313_p12, %p1312_p11 }
 0x40c   : > { %1010 = vmatprep.subr.mxu0 %v1377_v34  ;;  %1034 = vmatpush3.msra.mxu1 %v1614_v29 }
 0x40d   : > { %1011 = vmatpush3.msra.mxu0 %v1582_v7  ;;  %1035 = vmatprep.mubr.msk.f32.mxu1 %vm1378_vm5, %v1377_v34  ;;  %p1315_p0 = pnand (%p669_p9), %p1314_p13, %p1308_p10 }
 0x40e   : > { %1012 = vmatprep.subr.mxu0 %v1377_v34 }
 0x40f   : > { %1013 = vmatpush3.msra.mxu0 %v1580_v6 }
 0x410   : > { %1014 = vmatprep.subr.mxu0 %v1377_v34 }
 0x411   : > { %1015 = vmatpush3.msra.mxu0 %v1576_v4 }
 0x412   : > { %1016 = vmatprep.subr.mxu0 %v1377_v34 }
 0x413   : > { %1017 = vmatpush3.msra.mxu0 %v1574_v3 }
 0x414   : > { %1018 = vmatprep.subr.mxu0 %v1377_v34 }
 0x415   : > { %1019 = vmatpush3.msra.mxu0 %v1572_v2 }
 0x416   : > { %1020 = vmatprep.subr.mxu0 %v1377_v34 }
 0x417   : > { %1021 = vmatpush3.msra.mxu0 %v1566_v1 }
 0x418   : > { %1022 = vmatprep.subr.mxu0 %v1377_v34 }
 0x419   : > { %1023 = vmatpush3.msra.mxu0 %v1564_v0 }
 0x474   : > { %v680_v36 = vpop.permute.xlu0 %679 }
 0x475   : > { %v686_v38 = vsel %vm175_vm0, %v675_v37, %v680_v36 }
 0x478   : > { %v684_v39 = vpop.permute.xlu0 %683 }
 0x479   : > { %v688_v40 = vsel %vm219_vm1, %v686_v38, %v684_v39 }
 0x47a   : > { %1025 = vmatmul.mubr.msk.f32.vlgmr.msra.gmra.mxu0 %vm221_vm2, %v688_v40 }
 0x53a   : > { %v759_v41 = vpop.f32.mrf.mxu0 }
 0x53b   : > { %v760_v42 = vadd.f32 %v759_v41, %v1612_v28 }
 0x53c   : > { %v1026_v43 = vpop.f32.mrf.mxu0 }
 0x53d   : > { %1095 = vtanh.f32 %v760_v42  ;;  %v942_v45 = vmul.f32 -1.442695, %v760_v42 }
 0x53f   : > { %1097 = vpow2.f32 %v942_v45 }
 0x54a   : > { %v1096_v44 = vpop.eup %1095 }
 0x54b   : > { %775 = vrot.lane.b32.xlu1 %v1096_v44, %s1379_s23 }
 0x54c   : > { %v1098_v46 = vpop.eup %1097 }
 0x54d   : > { %v766_v47 = vadd.f32 1.0, %v1098_v46 }
 0x54f   : > { %770 = vrot.lane.b32.xlu1 %v677_v35, %s1376_s11  ;;  %1099 = vrcp.f32 %v766_v47 }
 0x55c   : > { %v1100_v48 = vpop.eup %1099 }
 0x5bd   : > { %v776_v49 = vpop.permute.xlu1 %775 }
 0x5be   : > { %v778_v50 = vmul.f32 %v1100_v48, %v776_v49 }
 0x5c0   : > { %780 = vrot.lane.b32.xlu0 %v778_v50, %s1376_s11 }
 0x5c1   : > { %v771_v51 = vpop.permute.xlu1 %770 }
 0x5c2   : > { %v773_v52 = vmul.f32 %v1100_v48, %v771_v51 }
 0x632   : > { %v781_v53 = vpop.permute.xlu0 %780 }
 0x633   : > { %v783_v54 = vadd.f32 %v781_v53, %v773_v52 }
 0x635   : > { %1101 = vtanh.f32 %v783_v54 }
 0x642   : > { %v1102_v55 = vpop.eup %1101 }
 0x643   : > { %786 = vrot.lane.b32.xlu1 %v1102_v55, %s1379_s23 }
 0x6b5   : > { %v787_v56 = vpop.permute.xlu1 %786 }
 0x6b6   : > { %v789_v57 = vmul.f32 %v1100_v48, %v787_v56 }
 0x6b8   : > { %791 = vrot.lane.b32.xlu0 %v789_v57, %s1376_s11 }
 0x72a   : > { %v792_v58 = vpop.permute.xlu0 %791 }
 0x72b   : > { %794 = vst.msk [vmem:[#allocation8] sm:$0xff] %vm175_vm0, %v792_v58  ;;  %1036 = vmatmul.mubr.msk.f32.vlgmr.msra.gmra.mxu1 %vm175_vm0, %v792_v58 }
 0x7eb   : > { %v868_v59 = vpop.f32.mrf.mxu1 }
 0x7ec   : > { %v869_v60 = vadd.f32 %v1607_v26, %v868_v59 }
 0x7ed   : > { %v1037_v61 = vpop.f32.mrf.mxu1 }
 0x7ee   : > { %v872_v62 = vsel %vm666_vm4, %v869_v60, -1e+30 }
 0x7ef   : > { %873 = vmax.xlane.f32.xlu1 %v872_v62 }
 0x878   : > { %v874_v63 = vpop.xlane.xlu1 %873 }
 0x879   : > { %v875_v14 = vsub.f32 %v872_v62, %v874_v63 }
 0x87b   : > { %v876_v15 = vmul.f32 1.442695, %v875_v14 }
 0x87d   : > { %1103 = vpow2.f32 %v876_v15 }
 0x88a   : > { %v1104_v16 = vpop.eup %1103 }
 0x88b   : > { %878 = vadd.xlane.f32.xlu0 %v1104_v16 }
 0x8a1   : > { %796 = vrot.lane.b32.xlu0 %v783_v54, %s1380_s25 }
 0x914   : > { %v879_v17 = vpop.xlane.xlu0 %878 }
 0x915   : > { %1105 = vlog2.f32 %v879_v17 }
 0x918   : > { %v797_v18 = vpop.permute.xlu0 %796 }
 0x919   : > { %799 = vst.msk [vmem:[#allocation9] sm:$0xff] %vm175_vm0, %v797_v18 }
 0x922   : > { %v1106_v9 = vpop.eup %1105 }
 0x923   : > { %v881_v5 = vmul.f32 0.6931472, %v1106_v9  ;;  %671 = sbr.rel (!%p669_p9) target bundleno = 1025 (0x401), region = 141 }
 0x925   : > { %v882_v19 = vsub.f32 %v875_v14, %v881_v5 }
 0x927   : > { %884 = vst [vmem:[%s883_s28] sm:$0xff] %v882_v19 }
 0x928   :  { %1318 = shalt.err (!%p1315_p0)
}
 0x929   :  { %896 = dma.vmem_to_hbm [thread:$0]  %s891_s29, 1024, %s1686_s12, [#allocation12], %s1359_s26, %s1359_s26, %s1360_s27  }
 0x92a   :  { %1347 = dma.done.wait [#allocation12], 1024  }
 0x92b   :  { %1348 = vsyncadd [#allocation12], 4294966272 }
 0x92c   :  { %900 = vsyncpa [#allocation11], 1 }
 0x92d   :  { %901 = vsyncpa [#allocation14], 1 }
 0x92e   :  { %902 = vsyncpa [#allocation17], 1 }
 0x92f   :  { %903 = vsyncpa [#allocation20], 1 }
 0x930   :  { %904 = vsyncpa [#allocation23], 1 }
 0x931   :  { %905 = vsyncpa [#allocation26], 1 }
 0x932   :  { %906 = vsyncpa [#allocation12], 1 }

</bundles_post_ra>
